<compile_context>
chip_gen: v5e
topology: v5e:2x2
jax: 0.10.0
libtpu: 0.0.40
codegen_flags: <defaults>
</compile_context>

<pallas_src>
import jax
import jax.numpy as jnp
from jax.experimental import pallas as pl
from jax.experimental.pallas import tpu as pltpu


# ----------------------------------------------------------------------------- kernel
def _classifier_domain_kernel(x_ref, w1t_ref, b1_ref, w2t_ref, b2_ref, o_ref, h_ref):
    # GradientReversal is the identity in the forward pass; the -lambda reversal lives in
    # the custom_vjp backward below.
    x = x_ref[...].astype(jnp.bfloat16)                       # (TB, D)   bf16 MXU operand
    h = jnp.dot(x, w1t_ref[...],
                preferred_element_type=jnp.float32)           # (TB, Hp)  f32 accumulate
    h = jnp.maximum(h + b1_ref[...], 0.0)                     # bias + ReLU, full-vreg f32
    hb = h.astype(jnp.bfloat16)
    h_ref[...] = hb                                           # residual for the backward
    out = jnp.dot(hb, w2t_ref[...],
                  preferred_element_type=jnp.float32)         # (TB, Cp)  f32 accumulate
    o_ref[...] = (out + b2_ref[...]).astype(o_ref.dtype)      # lane-dense bf16 store


def _round_up(n, m):
    return ((n + m - 1) // m) * m


def _vmem_ceiling_bytes():
    # Generation-aware VMEM budget: ~80% of physical (v5e/v6e: ~102 MiB, v7x: ~51 MiB).
    try:
        cap = int(pltpu.get_tpu_info().vmem_capacity_bytes)
    except Exception:
        cap = 64 << 20
    return max(int(cap * 0.8), 32 << 20)


def _forward_pallas(x, w1t, b1, w2t, b2):
    """x:(B,D), w1t:(D,Hp) bf16, b1:(1,Hp) f32, w2t:(Hp,Cp) bf16, b2:(1,Cp) f32."""
    B, D = x.shape
    Dw, Hp = w1t.shape
    Hw, Cp = w2t.shape
    assert D == Dw and Hp == Hw and b1.shape == (1, Hp) and b2.shape == (1, Cp)
    assert Hp % 128 == 0 and Cp % 128 == 0, "hidden/class dims must be pre-padded to 128 lanes"

    # Batch tile: whole batch for small B; otherwise split into >=2 grid steps (v7x dual
    # TensorCores) and scale the tile up to 2048 rows (amortize ~0.35us per-step overhead).
    if B <= 256:
        TB = B
    else:
        TB = min(2048, _round_up(pl.cdiv(B, 2), 8))
    grid = (pl.cdiv(B, TB),)

    xbytes = x.dtype.itemsize
    resident = D * Hp * w1t.dtype.itemsize + Hp * Cp * w2t.dtype.itemsize + (Hp + Cp) * 4
    tile_bytes = 2 * TB * (D * xbytes + (Cp + Hp) * 2) + resident   # 2x = double-buffering
    vmem_limit = int(min(max(int(1.25 * tile_bytes), 32 << 20), _vmem_ceiling_bytes()))
    # TODO(synk): for very large D (resident bf16 W1T ~ D*Hp*2 bytes approaching the VMEM
    # ceiling, D ~ 10k+ on v7x's 64 MiB), add a D-reduction grid axis ("arbitrary" + f32 acc
    # scratch + pl.when init/finalize) instead of keeping W1T fully resident.

    cost = pl.CostEstimate(
        flops=2 * B * (D * Hp + Hp * Cp),
        transcendentals=0,
        bytes_accessed=B * D * xbytes + resident + B * (Cp + Hp) * 2,
    )

    return pl.pallas_call(
        _classifier_domain_kernel,
        out_shape=(
            jax.ShapeDtypeStruct((B, Cp), jnp.bfloat16),     # padded logits (bf16 writeback)
            jax.ShapeDtypeStruct((B, Hp), jnp.bfloat16),     # h residual for the backward
        ),
        grid=grid,
        in_specs=[
            pl.BlockSpec((TB, D), lambda i: (i, 0)),         # x tile, pipelined over batch
            pl.BlockSpec((D, Hp), lambda i: (0, 0)),         # W1T resident
            pl.BlockSpec((1, Hp), lambda i: (0, 0)),         # b1 resident
            pl.BlockSpec((Hp, Cp), lambda i: (0, 0)),        # W2T resident
            pl.BlockSpec((1, Cp), lambda i: (0, 0)),         # b2 resident
        ],
        out_specs=(
            pl.BlockSpec((TB, Cp), lambda i: (i, 0)),
            pl.BlockSpec((TB, Hp), lambda i: (i, 0)),
        ),
        compiler_params=pltpu.CompilerParams(
            dimension_semantics=("parallel",),               # megacore / dual-TC batch split
            vmem_limit_bytes=vmem_limit,
        ),
        cost_estimate=cost,
    )(x, w1t, b1, w2t, b2)


# -------------------------------------------------------- gradient-reversal custom VJP
@jax.custom_vjp
def _domain_head_apply(x, w1t, b1, w2t, b2, lambda_):
    out, _ = _forward_pallas(x, w1t, b1, w2t, b2)
    return out


def _domain_head_fwd(x, w1t, b1, w2t, b2, lambda_):
    out, h = _forward_pallas(x, w1t, b1, w2t, b2)
    return out, (x, h, w1t, w2t, lambda_)


def _domain_head_bwd(res, g):
    # Tiny-head backward in plain JAX; reuses the h residual from the forward kernel
    # (no x @ W1T recompute) and applies the -lambda gradient reversal to dx.
    x, h, w1t, w2t, lambda_ = res
    g = g.astype(jnp.float32)                                    # (B, Cp)
    hf = h.astype(jnp.float32)                                   # (B, Hp)

    db2 = jnp.sum(g, axis=0, keepdims=True)                      # (1, Cp) f32
    dw2t = jnp.dot(hf.T, g).astype(w2t.dtype)                    # (Hp, Cp)
    dh = jnp.dot(g, w2t.astype(jnp.float32).T)                   # (B, Hp)
    dpre = jnp.where(hf > 0.0, dh, 0.0)                          # ReLU backward via saved h
    db1 = jnp.sum(dpre, axis=0, keepdims=True)                   # (1, Hp) f32
    dw1t = jnp.dot(x.astype(jnp.float32).T, dpre).astype(w1t.dtype)   # (D, Hp)
    dx = jnp.dot(dpre, w1t.astype(jnp.float32).T)                # (B, D)
    dx = (-lambda_.astype(jnp.float32) * dx).astype(x.dtype)     # gradient reversal
    dlambda = jnp.zeros_like(lambda_)                            # lambda is not trained
    return (dx, dw1t, db1, dw2t, db2, dlambda)


_domain_head_apply.defvjp(_domain_head_fwd, _domain_head_bwd)


def classifier_domain_forward(x, w1t, b1, w2t_pad, b2_pad, n_class, lambda_=1.0):
    """Fused GRL -> fc1 -> ReLU -> fc3; returns (B, n_class) bfloat16 logits."""
    lam = jnp.asarray(lambda_, dtype=jnp.float32)     # traced: annealing never retraces
    out_pad = _domain_head_apply(x, w1t, b1, w2t_pad, b2_pad, lam)
    return out_pad[:, :n_class]


# ------------------------------------------------------------------------------ params
def init_params(key, n_class, input_dim):
    """nn.Linear-style init; weights pre-transposed + bf16; hidden and class dims
    zero-padded to multiples of 128 lanes (done ONCE here, never per call).

    Note: grads come back in bf16 to match these params; for long training runs keep f32
    master copies outside and re-derive these bf16 operands after each optimizer update.
    """
    hidden = input_dim // 4
    h_pad = _round_up(hidden, 128)
    c_pad = _round_up(n_class, 128)
    k1, k2, k3, k4 = jax.random.split(key, 4)
    bound1 = 1.0 / float(input_dim) ** 0.5
    bound2 = 1.0 / float(hidden) ** 0.5
    w1 = jax.random.uniform(k1, (hidden, input_dim), jnp.float32, -bound1, bound1)
    b1 = jax.random.uniform(k2, (hidden,), jnp.float32, -bound1, bound1)
    w2 = jax.random.uniform(k3, (n_class, hidden), jnp.float32, -bound2, bound2)
    b2 = jax.random.uniform(k4, (n_class,), jnp.float32, -bound2, bound2)

    # One-time layout work: transpose, cast to bf16, zero-pad H and C to 128 lanes.
    w1t_pad = jnp.zeros((input_dim, h_pad), jnp.bfloat16)
    w1t_pad = w1t_pad.at[:, :hidden].set(jnp.transpose(w1).astype(jnp.bfloat16))
    b1_pad = jnp.zeros((1, h_pad), jnp.float32).at[:, :hidden].set(b1.reshape(1, hidden))
    w2t_pad = jnp.zeros((h_pad, c_pad), jnp.bfloat16)
    w2t_pad = w2t_pad.at[:hidden, :n_class].set(jnp.transpose(w2).astype(jnp.bfloat16))
    b2_pad = jnp.zeros((1, c_pad), jnp.float32).at[:, :n_class].set(b2.reshape(1, n_class))
    return w1t_pad, b1_pad, w2t_pad, b2_pad


# -------------------------------------------------------------------------------- main
if __name__ == "__main__":
    key = jax.random.PRNGKey(0)
    batch = 8
    input_dim = 128      # -> hidden = 32 (zero-padded to 128 lanes)
    n_class = 4          # zero-padded to 128 lanes, sliced back in the wrapper

    kx, kp = jax.random.split(key)
    # bf16 activations straight into the kernel (halves the x HBM stream).
    x = jax.random.normal(kx, (batch, input_dim), dtype=jnp.float32).astype(jnp.bfloat16)
    w1t, b1, w2t, b2 = init_params(kp, n_class, input_dim)

    out = classifier_domain_forward(x, w1t, b1, w2t, b2, n_class, lambda_=1.0)
    out = jax.block_until_ready(out)
    assert out.shape == (batch, n_class)

    # Plain-JAX reference with identical math (bf16 operands, f32 accumulate/epilogue).
    def plain_head(xx):
        xb = xx.astype(jnp.bfloat16)
        h = jnp.maximum(jnp.dot(xb, w1t, preferred_element_type=jnp.float32) + b1, 0.0)
        o = jnp.dot(h.astype(jnp.bfloat16), w2t, preferred_element_type=jnp.float32) + b2
        return o[:, :n_class].astype(jnp.bfloat16)

    ref = plain_head(x)
    assert jnp.allclose(out.astype(jnp.float32), ref.astype(jnp.float32),
                        atol=2e-2, rtol=2e-2), "forward mismatch vs reference"

    # Gradient-reversal semantics: d/dx of the fused head equals -lambda * (plain head grad).
    lam = 2.0
    g_rev = jax.grad(lambda xx: jnp.sum(classifier_domain_forward(
        xx, w1t, b1, w2t, b2, n_class, lam).astype(jnp.float32)))(x)
    g_plain = jax.grad(lambda xx: jnp.sum(plain_head(xx).astype(jnp.float32)))(x)
    g_rev = jax.block_until_ready(g_rev)
    assert jnp.allclose(g_rev.astype(jnp.float32), -lam * g_plain.astype(jnp.float32),
                        atol=5e-2, rtol=5e-2), "reversed grad mismatch"

    print("KERNEL_OK")
</pallas_src>

<mosaic_0001>
module attributes {stable_mosaic.version = 11 : i64} {
  func.func @_classifier_domain_kernel(%arg0: i32, %arg1: memref<8x128xbf16, #tpu.memory_space<vmem>>, %arg2: memref<128x128xbf16, #tpu.memory_space<vmem>>, %arg3: memref<1x128xf32, #tpu.memory_space<vmem>>, %arg4: memref<128x128xbf16, #tpu.memory_space<vmem>>, %arg5: memref<1x128xf32, #tpu.memory_space<vmem>>, %arg6: memref<8x128xbf16, #tpu.memory_space<vmem>>, %arg7: memref<8x128xbf16, #tpu.memory_space<vmem>>) attributes {dimension_semantics = [#tpu.dimension_semantics<parallel>], iteration_bounds = array<i64: 1>, scalar_prefetch = 0 : i64, scratch_operands = 0 : i64, tpu.core_type = #tpu.core_type<tc>, window_params = [{transform_indices = @transform_0, window_bounds = array<i64: 8, 128>}, {pipeline_mode = #tpu.pipeline_mode<synchronous>, transform_indices = @transform_1, window_bounds = array<i64: 128, 128>}, {pipeline_mode = #tpu.pipeline_mode<synchronous>, transform_indices = @transform_2, window_bounds = array<i64: 1, 128>}, {pipeline_mode = #tpu.pipeline_mode<synchronous>, transform_indices = @transform_3, window_bounds = array<i64: 128, 128>}, {pipeline_mode = #tpu.pipeline_mode<synchronous>, transform_indices = @transform_4, window_bounds = array<i64: 1, 128>}, {transform_indices = @transform_5, window_bounds = array<i64: 8, 128>}, {transform_indices = @transform_6, window_bounds = array<i64: 8, 128>}]} {
    %c0 = arith.constant 0 : index
    %c0_0 = arith.constant 0 : index
    %0 = vector.load %arg1[%c0, %c0_0] : memref<8x128xbf16, #tpu.memory_space<vmem>>, vector<8x128xbf16>
    %c0_1 = arith.constant 0 : index
    %c0_2 = arith.constant 0 : index
    %1 = vector.load %arg2[%c0_1, %c0_2] : memref<128x128xbf16, #tpu.memory_space<vmem>>, vector<128x128xbf16>
    %cst = arith.constant dense<0.000000e+00> : vector<8x128xf32>
    %2 = tpu.matmul %0, %1, %cst {dimension_numbers = #tpu.dot_dimension_numbers<[1], [0], [0], [1], [0, 0, 1, 1], [], []>} : vector<8x128xbf16>, vector<128x128xbf16>, vector<8x128xf32> -> vector<8x128xf32>
    %c0_3 = arith.constant 0 : index
    %c0_4 = arith.constant 0 : index
    %3 = vector.load %arg3[%c0_3, %c0_4] : memref<1x128xf32, #tpu.memory_space<vmem>>, vector<1x128xf32>
    %4 = vector.broadcast %3 : vector<1x128xf32> to vector<8x128xf32>
    %5 = arith.addf %2, %4 : vector<8x128xf32>
    %cst_5 = arith.constant 0.000000e+00 : f32
    %6 = vector.broadcast %cst_5 : f32 to vector<8x128xf32>
    %7 = arith.maximumf %5, %6 : vector<8x128xf32>
    %8 = arith.truncf %7 : vector<8x128xf32> to vector<8x128xbf16>
    %c0_6 = arith.constant 0 : index
    %c0_7 = arith.constant 0 : index
    %9 = vector.load %arg7[%c0_6, %c0_7] : memref<8x128xbf16, #tpu.memory_space<vmem>>, vector<8x128xbf16>
    tpu.vector_store %arg7[%c0_6, %c0_7], %8 {strides = array<i32>} : memref<8x128xbf16, #tpu.memory_space<vmem>>, vector<8x128xbf16>,
    %c0_8 = arith.constant 0 : index
    %c0_9 = arith.constant 0 : index
    %10 = vector.load %arg4[%c0_8, %c0_9] : memref<128x128xbf16, #tpu.memory_space<vmem>>, vector<128x128xbf16>
    %cst_10 = arith.constant dense<0.000000e+00> : vector<8x128xf32>
    %11 = tpu.matmul %8, %10, %cst_10 {dimension_numbers = #tpu.dot_dimension_numbers<[1], [0], [0], [1], [0, 0, 1, 1], [], []>} : vector<8x128xbf16>, vector<128x128xbf16>, vector<8x128xf32> -> vector<8x128xf32>
    %c0_11 = arith.constant 0 : index
    %c0_12 = arith.constant 0 : index
    %12 = vector.load %arg5[%c0_11, %c0_12] : memref<1x128xf32, #tpu.memory_space<vmem>>, vector<1x128xf32>
    %13 = vector.broadcast %12 : vector<1x128xf32> to vector<8x128xf32>
    %14 = arith.addf %11, %13 : vector<8x128xf32>
    %15 = arith.truncf %14 : vector<8x128xf32> to vector<8x128xbf16>
    %c0_13 = arith.constant 0 : index
    %c0_14 = arith.constant 0 : index
    %16 = vector.load %arg6[%c0_13, %c0_14] : memref<8x128xbf16, #tpu.memory_space<vmem>>, vector<8x128xbf16>
    tpu.vector_store %arg6[%c0_13, %c0_14], %15 {strides = array<i32>} : memref<8x128xbf16, #tpu.memory_space<vmem>>, vector<8x128xbf16>,
    return
  }
  func.func @transform_0(%arg0: i32) -> (i32, i32) {
    %c0_i32 = arith.constant 0 : i32
    %c0_i32_0 = arith.constant 0 : i32
    return %arg0, %c0_i32 : i32, i32
  }
  func.func @transform_1(%arg0: i32) -> (i32, i32) {
    %c0_i32 = arith.constant 0 : i32
    %c0_i32_0 = arith.constant 0 : i32
    %c0_i32_1 = arith.constant 0 : i32
    return %c0_i32, %c0_i32_0 : i32, i32
  }
  func.func @transform_2(%arg0: i32) -> (i32, i32) {
    %c0_i32 = arith.constant 0 : i32
    %c0_i32_0 = arith.constant 0 : i32
    %c0_i32_1 = arith.constant 0 : i32
    return %c0_i32, %c0_i32_0 : i32, i32
  }
  func.func @transform_3(%arg0: i32) -> (i32, i32) {
    %c0_i32 = arith.constant 0 : i32
    %c0_i32_0 = arith.constant 0 : i32
    %c0_i32_1 = arith.constant 0 : i32
    return %c0_i32, %c0_i32_0 : i32, i32
  }
  func.func @transform_4(%arg0: i32) -> (i32, i32) {
    %c0_i32 = arith.constant 0 : i32
    %c0_i32_0 = arith.constant 0 : i32
    %c0_i32_1 = arith.constant 0 : i32
    return %c0_i32, %c0_i32_0 : i32, i32
  }
  func.func @transform_5(%arg0: i32) -> (i32, i32) {
    %c0_i32 = arith.constant 0 : i32
    %c0_i32_0 = arith.constant 0 : i32
    return %arg0, %c0_i32 : i32, i32
  }
  func.func @transform_6(%arg0: i32) -> (i32, i32) {
    %c0_i32 = arith.constant 0 : i32
    %c0_i32_0 = arith.constant 0 : i32
    return %arg0, %c0_i32 : i32, i32
  }
}

</mosaic_0001>

<bundles_post_ra>
// kernel: tpu_custom_call.1
= control target key start
LH: loop header
LB: loop body
LE: loop exit
PB: predicated region body
PF: predicated region fallthrough
CT: control target
= control target key end

     0   :  { %12 = vsyncpa [#allocation3], 0  ;;  %s551_s0 = inlined_call_operand.hbm [shape: bf16[8,128], index: 0, kind: input, shape index: {}]   ;;  %s552_s1 = inlined_call_operand.hbm [shape: bf16[128,128], index: 1, kind: input, shape index: {}]   ;;  %s553_s2 = inlined_call_operand.vmem [shape: f32[1,128], index: 2, kind: input, shape index: {}]   ;;  %s554_s3 = inlined_call_operand.hbm [shape: bf16[128,128], index: 3, kind: input, shape index: {}]   ;;  %s555_s4 = inlined_call_operand.vmem [shape: f32[1,128], index: 4, kind: input, shape index: {}]   ;;  %s556_s5 = inlined_call_operand.hbm [shape: bf16[8,128], index: 5, kind: output, shape index: {0}]   ;;  %s557_s6 = inlined_call_operand.hbm [shape: bf16[8,128], index: 6, kind: output, shape index: {1}]  }
   0x1   :  { %13 = vsyncpa [#allocation6], 0 }
   0x2   :  { %14 = vsyncpa [#allocation4], 0  ;;  %s31_s23 = sshll.u32 %s552_s1, 4  ;;  %s32_s23 = int_to_ptr.hbm [resolvable:$true] %s31_s23 }
   0x3   :  { %15 = vsyncpa [#allocation10], 0  ;;  %s488_s24 = smov [#allocation5]   ;;  %s21_s28 = sshll.u32 %s551_s0, 4  ;;  %s22_s28 = int_to_ptr.hbm [resolvable:$true] %s21_s28 }
   0x4   :  { %s33_s25 = sshll.u32 %s488_s24, 4  ;;  %s489_s29 = smov 64   ;;  %s34_s25 = int_to_ptr.vmem [resolvable:$true] %s33_s25 }
   0x5   :  { %s490_s30 = smov 4   ;;  %s491_s7 = smov [#allocation2]  }
   0x6   :  { %39 = dma.hbm_to_vmem [thread:$0]  %s32_s23, 1024, %s34_s25, [#allocation6], %s489_s29, %s489_s29, %s490_s30  }
   0x7   :  { %s23_s8 = sshll.u32 %s491_s7, 4  ;;  %s46_s11 = sshll.u32 %s554_s3, 4  ;;  %s24_s8 = int_to_ptr.vmem [resolvable:$true] %s23_s8  ;;  %s47_s11 = int_to_ptr.hbm [resolvable:$true] %s46_s11 }
   0x8   :  { %26 = dma.hbm_to_vmem [thread:$0]  %s22_s28, 64, %s24_s8, [#allocation3]  }
   0x9   :  { %s492_s1 = smov [#allocation7]  }
   0xa   :  { %s48_s12 = sshll.u32 %s492_s1, 4  ;;  %s49_s12 = int_to_ptr.vmem [resolvable:$true] %s48_s12 }
   0xb   :  { %54 = dma.hbm_to_vmem [thread:$0]  %s47_s11, 1024, %s49_s12, [#allocation6], %s489_s29, %s489_s29, %s490_s30  }
   0xc   :  { %480 = dma.done.wait [#allocation3], 64  }
   0xd   :  { %481 = vsyncadd [#allocation3], 4294967232 }
   0xe   :  { %482 = dma.done.wait [#allocation6], 2048  }
   0xf   :  { %483 = vsyncadd [#allocation6], 4294965248  ;;  %v342_v0 = vld [vmem:[#allocation5 + $0x38] sm:$0xff]  ;;  %v341_v1 = vld [vmem:[#allocation5 + $0x30] sm:$0xff]  ;;  %s493_s13 = smov [#allocation9]   ;;  %s255_s17 = sshll.u32 %s557_s6, 4  ;;  %s256_s17 = int_to_ptr.hbm [resolvable:$true] %s255_s17 }
  0x10   :  { %138 = vmatpush.bf16.msra.mxu0 %v342_v0  ;;  %v350_v2 = vld [vmem:[#allocation7 + $0x38] sm:$0xff]  ;;  %v349_v3 = vld [vmem:[#allocation7 + $0x30] sm:$0xff]  ;;  %v340_v4 = vld [vmem:[#allocation5 + $0x28] sm:$0xff]  ;;  %s253_s14 = sshll.u32 %s493_s13, 4  ;;  %s244_s23 = sshll.u32 %s556_s5, 4  ;;  %s254_s14 = int_to_ptr.vmem [resolvable:$true] %s253_s14  ;;  %s245_s23 = int_to_ptr.hbm [resolvable:$true] %s244_s23 }
  0x11   :  { %222 = vmatpush.bf16.msra.mxu1 %v350_v2  ;;  %v348_v5 = vld [vmem:[#allocation7 + $0x28] sm:$0xff]  ;;  %v339_v6 = vld [vmem:[#allocation5 + $0x20] sm:$0xff]  ;;  %v338_v8 = vld [vmem:[#allocation5 + $0x18] sm:$0xff] }
  0x12   :  { %v347_v7 = vld [vmem:[#allocation7 + $0x20] sm:$0xff]  ;;  %v346_v9 = vld [vmem:[#allocation7 + $0x18] sm:$0xff]  ;;  %v337_v10 = vld [vmem:[#allocation5 + $0x10] sm:$0xff] }
  0x13   :  { %v345_v11 = vld [vmem:[#allocation7 + $0x10] sm:$0xff]  ;;  %v336_v12 = vld [vmem:[#allocation5 + $0x8] sm:$0xff]  ;;  %v335_v13 = vld [vmem:[#allocation5] sm:$0xff] }
  0x14   :  { %139 = vmatpush.bf16.msra.mxu0 %v341_v1  ;;  %v69_v14 = vld [vmem:[#allocation2] sm:$0xf]  ;;  %v344_v15 = vld [vmem:[#allocation7 + $0x8] sm:$0xff]  ;;  %v343_v16 = vld [vmem:[#allocation7] sm:$0xff] }
  0x15   :  { %223 = vmatpush.bf16.msra.mxu1 %v349_v3  ;;  %v358_v17 = vld [vmem:[%s553_s2] ss:$0 sm:$0xff]  ;;  %s494_s2 = smov [#allocation8]  }
  0x16   :  { %v359_v23 = vld [vmem:[%s555_s4] ss:$0 sm:$0xff]  ;;  %s242_s20 = sshll.u32 %s494_s2, 4  ;;  %s243_s20 = int_to_ptr.vmem [resolvable:$true] %s242_s20 }
  0x18   :  { %140 = vmatpush.bf16.msra.mxu0 %v340_v4 }
  0x19   :  { %224 = vmatpush.bf16.msra.mxu1 %v348_v5 }
  0x1c   :  { %141 = vmatpush.bf16.msra.mxu0 %v339_v6 }
  0x1d   :  { %225 = vmatpush.bf16.msra.mxu1 %v347_v7 }
  0x20   :  { %142 = vmatpush.bf16.msra.mxu0 %v338_v8 }
  0x21   :  { %226 = vmatpush.bf16.msra.mxu1 %v346_v9 }
  0x24   :  { %143 = vmatpush.bf16.msra.mxu0 %v337_v10 }
  0x25   :  { %227 = vmatpush.bf16.msra.mxu1 %v345_v11 }
  0x28   :  { %144 = vmatpush.bf16.msra.mxu0 %v336_v12 }
  0x29   :  { %228 = vmatpush.bf16.msra.mxu1 %v344_v15 }
  0x2c   :  { %145 = vmatpush.bf16.msra.mxu0 %v335_v13 }
  0x2d   :  { %229 = vmatpush.bf16.msra.mxu1 %v343_v16 }
  0x2f   :  { %146 = vmatmul.bf16.vlgmr.msra.gmra.mxu0 %v69_v14 }
  0xac   :  { %v147_v18 = vpop.f32.mrf.mxu0 }
  0xad   :  { %v148_v19 = vadd.f32 %v358_v17, %v147_v18 }
  0xaf   :  { %v151_v20 = vmax.f32 %v148_v19, 0.0 }
  0xb1   :  { %v152_v21 = vpack.c.bf16 %v151_v20, %v151_v20 }
  0xb3   :  { %230 = vmatmul.bf16.vlgmr.msra.gmra.mxu1 %v152_v21  ;;  %153 = vst [vmem:[#allocation9] sm:$0xf] %v152_v21 }
  0xb4   :  { %v149_v22 = vpop.f32.mrf.mxu0  ;;  %258 = dma.vmem_to_hbm [thread:$0]  %s254_s14, 64, %s256_s17, [#allocation10]  }
 0x130   :  { %v231_v24 = vpop.f32.mrf.mxu1 }
 0x131   :  { %v232_v25 = vadd.f32 %v359_v23, %v231_v24 }
 0x133   :  { %v235_v26 = vpack.c.bf16 %v232_v25, %v232_v25 }
 0x135   :  { %236 = vst [vmem:[#allocation8] sm:$0xf] %v235_v26 }
 0x136   :  { %247 = dma.vmem_to_hbm [thread:$0]  %s243_s20, 64, %s245_s23, [#allocation4]  }
 0x138   :  { %v233_v27 = vpop.f32.mrf.mxu1 }
 0x139   :  { %484 = dma.done.wait [#allocation4], 64  }
 0x13a   :  { %485 = vsyncadd [#allocation4], 4294967232 }
 0x13b   :  { %486 = dma.done.wait [#allocation10], 64  }
 0x13c   :  { %487 = vsyncadd [#allocation10], 4294967232 }
 0x13d   :  { %267 = vsyncpa [#allocation3], 1 }
 0x13e   :  { %268 = vsyncpa [#allocation6], 1 }
 0x13f   :  { %269 = vsyncpa [#allocation4], 1 }
 0x140   :  { %270 = vsyncpa [#allocation10], 1 }

</bundles_post_ra>
